<compile_context>
chip_gen: v7x
topology: tpu7x:2x2x1
jax: 0.10.0
libtpu: 0.0.40
codegen_flags: <defaults>
</compile_context>

<pallas_src>
import jax
import jax.numpy as jnp
from jax.experimental import pallas as pl
from jax.experimental.pallas import tpu as pltpu


# ------------------------------ Pallas kernel ------------------------------ #

def _unit2_kernel(f_ref, w1_ref, b1_ref, wm_ref, ws_ref, bo_ref, o_ref):
    """Whole ShufflenetUnit2 on one (channels, n)-tile.

    Layout: channels on sublanes, flattened output pixels n = (b, ho, wo) on
    lanes (n is a multiple of 128 -> lane-dense loads/stores and matmuls).

    f_ref rows = [9 taps x in_c channels of im2col(x, 3x3, stride 2, pad 1);
                  9 "this tap reads zero-padding" indicator rows].
    """
    # Up-cast the bf16 stream once; every dot runs on f32 operands (fixes the
    # unsupported bf16 x bf16 -> f32 dot; on TPU the default matmul precision
    # still runs these as single-pass bf16 MXU ops, so nothing is lost).
    f = f_ref[...].astype(jnp.float32)                        # (9*cin + 9, tn)

    # conv1 (1x1) + BN + ReLU, evaluated at all 9 tap positions with a single
    # block-diagonal GEMM (the indicator rows have zero weight columns).  The
    # zero-block FLOPs are free relative to 9 separate tiny-K MXU issues.
    h1 = jnp.dot(w1_ref[...], f, preferred_element_type=jnp.float32)
    h1 = jnp.maximum(h1 + b1_ref[...], 0.0)                   # (9*mid, tn)

    # GEMM 2: 3x3 dconv+BN with conv2+BN folded into its weights (K = 9*mid).
    # GEMM 3: shortcut 3x3 conv+BN with sc_conv+BN folded in (K = 9*cin + 9);
    #   its last 9 columns are -C, the rank-9 padding correction that removes
    #   the spurious relu(b1) conv1 output at zero-padded tap positions.
    # concat + channelShuffle(groups=2) are pre-folded into the ROWS of
    # wm / ws / bo, so the epilogue is a single bias + ReLU.
    acc = jnp.dot(wm_ref[...], h1, preferred_element_type=jnp.float32)
    acc = acc + jnp.dot(ws_ref[...], f, preferred_element_type=jnp.float32)
    o_ref[...] = jnp.maximum(acc + bo_ref[...], 0.0).astype(o_ref.dtype)


def _pick_tile(n_pad, cap=256):
    """Largest multiple-of-128 tile (<= cap) dividing n_pad; prefer an even
    number of grid steps so both v7x TensorCores get equal work.  The cap stays
    moderate because the (9*mid, tn) f32 conv1 activations live in vregs."""
    divs = [t for t in range(128, min(cap, n_pad) + 1, 128) if n_pad % t == 0]
    if not divs:
        return 128
    even = [t for t in divs if (n_pad // t) % 2 == 0]
    return max(even) if even else max(divs)


def _unit2_pallas(feat, ops, out_c):
    """feat: (9*cin + 9, N) bf16 = im2col taps of x + pad-indicator rows."""
    kf, n = feat.shape
    tm = ops["b1b"].shape[0]                          # 9 * mid
    n_pad = pl.cdiv(n, 128) * 128                     # lane-dense N
    if n_pad != n:
        feat = jnp.pad(feat, ((0, 0), (0, n_pad - n)))
    tn = _pick_tile(n_pad)
    grid = (n_pad // tn,)

    # Resident weights + double-buffered bf16 streams, with 4x headroom;
    # clamped well under v7x's 64 MiB VMEM (and its 32 MiB scoped default).
    weight_bytes = 4 * (tm * kf + tm + out_c * tm + out_c * kf + out_c)
    stream_bytes = 2 * 2 * tn * (kf + out_c)          # double-buffered, bf16
    vmem_limit = int(min(32 << 20, max(8 << 20, 4 * (weight_bytes + stream_bytes))))

    return pl.pallas_call(
        _unit2_kernel,
        out_shape=jax.ShapeDtypeStruct((out_c, n_pad), jnp.bfloat16),
        grid=grid,
        in_specs=[
            pl.BlockSpec((kf, tn), lambda i: (0, i)),      # streamed taps + indicators
            pl.BlockSpec((tm, kf), lambda i: (0, 0)),      # conv1 block-diag weights
            pl.BlockSpec((tm, 1), lambda i: (0, 0)),       # conv1 bias
            pl.BlockSpec((out_c, tm), lambda i: (0, 0)),   # dconv x conv2 (+shuffle)
            pl.BlockSpec((out_c, kf), lambda i: (0, 0)),   # shortcut + pad correction
            pl.BlockSpec((out_c, 1), lambda i: (0, 0)),    # fused output bias
        ],
        out_specs=pl.BlockSpec((out_c, tn), lambda i: (0, i)),
        compiler_params=pltpu.CompilerParams(
            dimension_semantics=("parallel",),
            vmem_limit_bytes=vmem_limit),
    )(feat, ops["w1b"], ops["b1b"], ops["wm"], ops["ws"], ops["bo"])


# -------------------------------- JAX glue --------------------------------- #

def _im2col_taps_nchw(x_nchw, ksize, stride, pad):
    """NCHW -> (T, C, N) tap matrices, N = B*Ho*Wo flattened as (b, ho, wo)."""
    B, C, H, W = x_nchw.shape
    xp = jnp.pad(x_nchw, ((0, 0), (0, 0), (pad, pad), (pad, pad)))
    Ho = (H + 2 * pad - ksize) // stride + 1
    Wo = (W + 2 * pad - ksize) // stride + 1
    taps = []
    for ky in range(ksize):
        for kx in range(ksize):
            sl = xp[:, :, ky:ky + stride * (Ho - 1) + 1:stride,
                          kx:kx + stride * (Wo - 1) + 1:stride]      # (B,C,Ho,Wo)
            taps.append(jnp.transpose(sl, (1, 0, 2, 3)).reshape(C, B * Ho * Wo))
    return jnp.stack(taps, axis=0), (B, Ho, Wo)


def _pad_invalid_mask(B, H, W, Ho, Wo, stride, pad, ksize):
    """(T, B*Ho*Wo) bf16 indicator: 1 where tap t reads spatial zero-padding."""
    ho = jnp.arange(Ho) * stride - pad
    wo = jnp.arange(Wo) * stride - pad
    rows = []
    for ky in range(ksize):
        hi = ho + ky
        hbad = (hi < 0) | (hi >= H)                         # (Ho,)
        for kx in range(ksize):
            wi = wo + kx
            wbad = (wi < 0) | (wi >= W)                     # (Wo,)
            bad = hbad[:, None] | wbad[None, :]             # (Ho, Wo)
            rows.append(jnp.broadcast_to(bad[None], (B, Ho, Wo)).reshape(-1))
    return jnp.stack(rows, axis=0).astype(jnp.bfloat16)


def _shuffle_perm(channels, groups):
    """channelShuffle: shuffled[k] = original[perm[k]]."""
    k = jnp.arange(channels)
    j = k % (channels // groups)
    g = k // (channels // groups)
    return j * groups + g


def _prepare_unit2_operands(p, in_c, out_c):
    """Fold BN-folded per-layer conv params into the 3-GEMM kernel operands."""
    T = 9
    mid = out_c // 2
    c_main = out_c - in_c

    w1, b1 = p["conv1"]          # (1, in_c, mid),   (mid,)
    wd, bd = p["dconv"]          # (9, mid, mid),    (mid,)
    w2, b2 = p["conv2"]          # (1, mid, c_main), (c_main,)
    wsd, bsd = p["sc_dconv"]     # (9, in_c, in_c),  (in_c,)
    wsc, bsc = p["sc_conv"]      # (1, in_c, in_c),  (in_c,)

    # conv2 + shortcut-conv + concat + channelShuffle(groups=2) as one
    # row-permuted block matrix acting on [h2; s1].
    perm = _shuffle_perm(out_c, 2)
    wf = jnp.zeros((out_c, mid + in_c), jnp.float32)
    wf = wf.at[:c_main, :mid].set(w2[0].T)
    wf = wf.at[c_main:, mid:].set(wsc[0].T)
    bf_ = jnp.concatenate([b2, bsc])
    wf, bf_ = wf[perm], bf_[perm]
    wfm, wfs = wf[:, :mid], wf[:, mid:]

    # Fold conv2 into the 3x3 "dconv" and sc_conv into the shortcut 3x3 conv
    # (no nonlinearity in between), flattened over the 9 taps -> long-K GEMMs.
    wm3 = jnp.einsum("od,tcd->otc", wfm, wd)           # (out_c, T, mid)
    ws3 = jnp.einsum("od,tcd->otc", wfs, wsd)          # (out_c, T, in_c)
    wm = wm3.reshape(out_c, T * mid)
    ws_flat = ws3.reshape(out_c, T * in_c)

    # conv1 for all 9 taps as one block-diagonal GEMM; zero columns act on the
    # 9 pad-indicator rows of the streamed input.
    w1t = w1[0].T                                       # (mid, in_c)
    w1b = jnp.kron(jnp.eye(T, dtype=jnp.float32), w1t)  # (T*mid, T*in_c)
    w1b = jnp.concatenate([w1b, jnp.zeros((T * mid, T), jnp.float32)], axis=1)
    b1b = jnp.tile(b1, T).reshape(T * mid, 1)

    # Padding correction: at a zero-padded tap conv1 outputs exactly relu(b1);
    # its folded main-branch contribution C[:, t] = (wfm @ wd[t].T) @ relu(b1)
    # is subtracted through the indicator rows -> rank-9 correction folded
    # into the shortcut GEMM (no per-tap masking in the kernel).
    corr = jnp.einsum("otc,c->ot", wm3, jnp.maximum(b1, 0.0))   # (out_c, T)
    ws = jnp.concatenate([ws_flat, -corr], axis=1)              # (out_c, T*in_c + T)

    bo = (wfm @ bd + wfs @ bsd + bf_).reshape(out_c, 1)

    return {"w1b": w1b, "b1b": b1b, "wm": wm, "ws": ws, "bo": bo}


def unit2_forward(x_nchw, params):
    """ShufflenetUnit2.forward — NCHW in / NCHW out like the PyTorch module."""
    B, in_c, H, W = x_nchw.shape
    c_main = params["conv2"][0].shape[-1]
    out_c = c_main + params["sc_conv"][0].shape[-1]

    # im2col of the (bf16-cast) input built directly from NCHW: the only
    # HBM-materialized intermediate, shared by both branches.
    taps, (_, Ho, Wo) = _im2col_taps_nchw(x_nchw.astype(jnp.bfloat16), 3, 2, 1)
    T, _, N = taps.shape
    inv = _pad_invalid_mask(B, H, W, Ho, Wo, 2, 1, 3)           # (T, N) bf16
    feat = jnp.concatenate([taps.reshape(T * in_c, N), inv], axis=0)

    ops = _prepare_unit2_operands(params, in_c, out_c)
    out = _unit2_pallas(feat, ops, out_c)                       # (out_c, n_pad) bf16
    out = out[:, :N].reshape(out_c, B, Ho, Wo).astype(jnp.float32)
    return jnp.transpose(out, (1, 0, 2, 3))                     # NCHW


# --------------------------- pure-JAX reference ----------------------------- #

def _conv_bn_ref(x_nchw, wb, ksize, stride, pad, relu):
    w, b = wb                                                   # (T,cin,cout), (cout,)
    taps, (B, Ho, Wo) = _im2col_taps_nchw(x_nchw, ksize, stride, pad)
    out = jnp.einsum("tcn,tcd->dn", taps, w) + b[:, None]
    if relu:
        out = jnp.maximum(out, 0.0)
    return jnp.transpose(out.reshape(-1, B, Ho, Wo), (1, 0, 2, 3))


def _channel_shuffle_nchw(x, groups):
    B, C, H, W = x.shape
    x = x.reshape(B, C // groups, groups, H, W)
    x = jnp.transpose(x, (0, 2, 1, 3, 4))
    return x.reshape(B, C, H, W)


def unit2_reference(x_nchw, p):
    """Pure-JAX f32 reference with the module's exact layer-by-layer semantics."""
    h = _conv_bn_ref(x_nchw, p["conv1"], 1, 1, 0, True)
    h = _conv_bn_ref(h, p["dconv"], 3, 2, 1, False)
    h = _conv_bn_ref(h, p["conv2"], 1, 1, 0, True)
    s = _conv_bn_ref(x_nchw, p["sc_dconv"], 3, 2, 1, False)
    s = _conv_bn_ref(s, p["sc_conv"], 1, 1, 0, True)
    y = jnp.concatenate([h, s], axis=1)
    return _channel_shuffle_nchw(y, 2)


# ---------------------------- parameter creation ---------------------------- #

def _init_conv_bn(key, cin, cout, ksize):
    """Synthetic Conv2d + BatchNorm(eval) params with BN folded into (W, b)."""
    kw, kb, kg, kbt, km, kv = jax.random.split(key, 6)
    T = ksize * ksize
    w = 0.1 * jax.random.normal(kw, (T, cin, cout), jnp.float32)   # tap order ky*k+kx
    b = 0.1 * jax.random.normal(kb, (cout,), jnp.float32)
    gamma = 1.0 + 0.1 * jax.random.normal(kg, (cout,), jnp.float32)
    beta = 0.1 * jax.random.normal(kbt, (cout,), jnp.float32)
    mean = 0.1 * jax.random.normal(km, (cout,), jnp.float32)
    var = jnp.abs(jax.random.normal(kv, (cout,), jnp.float32)) + 0.5
    scale = gamma * jax.lax.rsqrt(var + 1e-5)
    return w * scale[None, None, :], (b - mean) * scale + beta


def init_unit2_params(key, in_c, out_c):
    assert out_c % 2 == 0 and out_c > in_c
    k = jax.random.split(key, 5)
    return {
        "conv1": _init_conv_bn(k[0], in_c, out_c // 2, 1),
        "dconv": _init_conv_bn(k[1], out_c // 2, out_c // 2, 3),
        "conv2": _init_conv_bn(k[2], out_c // 2, out_c - in_c, 1),
        "sc_dconv": _init_conv_bn(k[3], in_c, in_c, 3),
        "sc_conv": _init_conv_bn(k[4], in_c, in_c, 1),
    }


# ------------------------------------ main ---------------------------------- #

if __name__ == "__main__":
    key = jax.random.PRNGKey(0)
    kx, kp = jax.random.split(key)

    B, in_c, out_c, H, W = 2, 8, 32, 16, 16
    x = jax.random.normal(kx, (B, in_c, H, W), jnp.float32)        # NCHW input
    params = init_unit2_params(kp, in_c, out_c)

    fwd = jax.jit(unit2_forward)
    out = jax.block_until_ready(fwd(x, params))
    assert out.shape == (B, out_c, H // 2, W // 2), out.shape
    assert out.dtype == jnp.float32

    # Check vs a reference fed the same bf16-quantized input (isolates the
    # kernel arithmetic from the intentional bf16 rounding of the tap stream).
    x_q = x.astype(jnp.bfloat16).astype(jnp.float32)
    ref_q = unit2_reference(x_q, params)
    err_q = float(jnp.max(jnp.abs(out - ref_q)))
    assert jnp.allclose(out, ref_q, rtol=2e-2, atol=2e-2), err_q

    # Looser sanity check vs the full-f32 reference (bounded by bf16 rounding).
    ref = unit2_reference(x, params)
    err = float(jnp.max(jnp.abs(out - ref)))
    assert jnp.allclose(out, ref, rtol=5e-2, atol=5e-2), err

    print("KERNEL_OK")
</pallas_src>

<mosaic_0001>
module attributes {stable_mosaic.version = 11 : i64} {
  func.func @_unit2_kernel(%arg0: i32, %arg1: memref<81x128xbf16, #tpu.memory_space<vmem>>, %arg2: memref<144x81xf32, #tpu.memory_space<vmem>>, %arg3: memref<144x1xf32, #tpu.memory_space<vmem>>, %arg4: memref<32x144xf32, #tpu.memory_space<vmem>>, %arg5: memref<32x81xf32, #tpu.memory_space<vmem>>, %arg6: memref<32x1xf32, #tpu.memory_space<vmem>>, %arg7: memref<32x128xbf16, #tpu.memory_space<vmem>>) attributes {dimension_semantics = [#tpu.dimension_semantics<parallel>], iteration_bounds = array<i64: 1>, scalar_prefetch = 0 : i64, scratch_operands = 0 : i64, tpu.core_type = #tpu.core_type<tc>, window_params = [{transform_indices = @transform_0, window_bounds = array<i64: 81, 128>}, {pipeline_mode = #tpu.pipeline_mode<synchronous>, transform_indices = @transform_1, window_bounds = array<i64: 144, 81>}, {pipeline_mode = #tpu.pipeline_mode<synchronous>, transform_indices = @transform_2, window_bounds = array<i64: 144, 1>}, {pipeline_mode = #tpu.pipeline_mode<synchronous>, transform_indices = @transform_3, window_bounds = array<i64: 32, 144>}, {pipeline_mode = #tpu.pipeline_mode<synchronous>, transform_indices = @transform_4, window_bounds = array<i64: 32, 81>}, {pipeline_mode = #tpu.pipeline_mode<synchronous>, transform_indices = @transform_5, window_bounds = array<i64: 32, 1>}, {transform_indices = @transform_6, window_bounds = array<i64: 32, 128>}]} {
    %c0 = arith.constant 0 : index
    %c0_0 = arith.constant 0 : index
    %0 = vector.load %arg1[%c0, %c0_0] : memref<81x128xbf16, #tpu.memory_space<vmem>>, vector<81x128xbf16>
    %1 = arith.extf %0 : vector<81x128xbf16> to vector<81x128xf32>
    %c0_1 = arith.constant 0 : index
    %c0_2 = arith.constant 0 : index
    %2 = vector.load %arg2[%c0_1, %c0_2] : memref<144x81xf32, #tpu.memory_space<vmem>>, vector<144x81xf32>
    %cst = arith.constant dense<0.000000e+00> : vector<144x128xf32>
    %3 = tpu.matmul %2, %1, %cst {dimension_numbers = #tpu.dot_dimension_numbers<[1], [0], [0], [1], [0, 0, 1, 1], [], []>} : vector<144x81xf32>, vector<81x128xf32>, vector<144x128xf32> -> vector<144x128xf32>
    %c0_3 = arith.constant 0 : index
    %c0_4 = arith.constant 0 : index
    %4 = vector.load %arg3[%c0_3, %c0_4] : memref<144x1xf32, #tpu.memory_space<vmem>>, vector<144x1xf32>
    %5 = vector.broadcast %4 : vector<144x1xf32> to vector<144x128xf32>
    %6 = arith.addf %3, %5 : vector<144x128xf32>
    %cst_5 = arith.constant 0.000000e+00 : f32
    %7 = vector.broadcast %cst_5 : f32 to vector<144x128xf32>
    %8 = arith.maximumf %6, %7 : vector<144x128xf32>
    %c0_6 = arith.constant 0 : index
    %c0_7 = arith.constant 0 : index
    %9 = vector.load %arg4[%c0_6, %c0_7] : memref<32x144xf32, #tpu.memory_space<vmem>>, vector<32x144xf32>
    %cst_8 = arith.constant dense<0.000000e+00> : vector<32x128xf32>
    %10 = tpu.matmul %9, %8, %cst_8 {dimension_numbers = #tpu.dot_dimension_numbers<[1], [0], [0], [1], [0, 0, 1, 1], [], []>} : vector<32x144xf32>, vector<144x128xf32>, vector<32x128xf32> -> vector<32x128xf32>
    %c0_9 = arith.constant 0 : index
    %c0_10 = arith.constant 0 : index
    %11 = vector.load %arg5[%c0_9, %c0_10] : memref<32x81xf32, #tpu.memory_space<vmem>>, vector<32x81xf32>
    %cst_11 = arith.constant dense<0.000000e+00> : vector<32x128xf32>
    %12 = tpu.matmul %11, %1, %cst_11 {dimension_numbers = #tpu.dot_dimension_numbers<[1], [0], [0], [1], [0, 0, 1, 1], [], []>} : vector<32x81xf32>, vector<81x128xf32>, vector<32x128xf32> -> vector<32x128xf32>
    %13 = arith.addf %10, %12 : vector<32x128xf32>
    %c0_12 = arith.constant 0 : index
    %c0_13 = arith.constant 0 : index
    %14 = vector.load %arg6[%c0_12, %c0_13] : memref<32x1xf32, #tpu.memory_space<vmem>>, vector<32x1xf32>
    %15 = vector.broadcast %14 : vector<32x1xf32> to vector<32x128xf32>
    %16 = arith.addf %13, %15 : vector<32x128xf32>
    %cst_14 = arith.constant 0.000000e+00 : f32
    %17 = vector.broadcast %cst_14 : f32 to vector<32x128xf32>
    %18 = arith.maximumf %16, %17 : vector<32x128xf32>
    %19 = arith.truncf %18 : vector<32x128xf32> to vector<32x128xbf16>
    %c0_15 = arith.constant 0 : index
    %c0_16 = arith.constant 0 : index
    %20 = vector.load %arg7[%c0_15, %c0_16] : memref<32x128xbf16, #tpu.memory_space<vmem>>, vector<32x128xbf16>
    tpu.vector_store %arg7[%c0_15, %c0_16], %19 {strides = array<i32>} : memref<32x128xbf16, #tpu.memory_space<vmem>>, vector<32x128xbf16>,
    return
  }
  func.func @transform_0(%arg0: i32) -> (i32, i32) {
    %c0_i32 = arith.constant 0 : i32
    %c0_i32_0 = arith.constant 0 : i32
    return %c0_i32, %arg0 : i32, i32
  }
  func.func @transform_1(%arg0: i32) -> (i32, i32) {
    %c0_i32 = arith.constant 0 : i32
    %c0_i32_0 = arith.constant 0 : i32
    %c0_i32_1 = arith.constant 0 : i32
    return %c0_i32, %c0_i32_0 : i32, i32
  }
  func.func @transform_2(%arg0: i32) -> (i32, i32) {
    %c0_i32 = arith.constant 0 : i32
    %c0_i32_0 = arith.constant 0 : i32
    %c0_i32_1 = arith.constant 0 : i32
    return %c0_i32, %c0_i32_0 : i32, i32
  }
  func.func @transform_3(%arg0: i32) -> (i32, i32) {
    %c0_i32 = arith.constant 0 : i32
    %c0_i32_0 = arith.constant 0 : i32
    %c0_i32_1 = arith.constant 0 : i32
    return %c0_i32, %c0_i32_0 : i32, i32
  }
  func.func @transform_4(%arg0: i32) -> (i32, i32) {
    %c0_i32 = arith.constant 0 : i32
    %c0_i32_0 = arith.constant 0 : i32
    %c0_i32_1 = arith.constant 0 : i32
    return %c0_i32, %c0_i32_0 : i32, i32
  }
  func.func @transform_5(%arg0: i32) -> (i32, i32) {
    %c0_i32 = arith.constant 0 : i32
    %c0_i32_0 = arith.constant 0 : i32
    %c0_i32_1 = arith.constant 0 : i32
    return %c0_i32, %c0_i32_0 : i32, i32
  }
  func.func @transform_6(%arg0: i32) -> (i32, i32) {
    %c0_i32 = arith.constant 0 : i32
    %c0_i32_0 = arith.constant 0 : i32
    return %c0_i32, %arg0 : i32, i32
  }
}

</mosaic_0001>

<bundles_post_ra>
// kernel: tile.8
= control target key start
LH: loop header
LB: loop body
LE: loop exit
PB: predicated region body
PF: predicated region fallthrough
CT: control target
= control target key end

     0   :  { %s28_s0 = inlined_call_operand.vmem [shape: f32[16], index: 0, kind: input, shape index: {}]   ;;  %s29_s1 = inlined_call_operand.vmem [shape: f32[9,16], index: 1, kind: output, shape index: {}]  }
   0x1   :  { %v4_v0 = vld [vmem:[%s28_s0] ss:$0 sm:$0xff] }
   0x2   :  { %5 = vst [vmem:[%s29_s1] sm:$0xff] %v4_v0  ;;  %8 = vst [vmem:[%s29_s1 + $0x8] sm:$0xff] %v4_v0 }

// kernel: tile.0
= control target key start
LH: loop header
LB: loop body
LE: loop exit
PB: predicated region body
PF: predicated region fallthrough
CT: control target
= control target key end

     0   :  { %vm3_vm0 = vcmask 7168   ;;  %s405_s8 = smov 126   ;;  %s406_s9 = smov 127   ;;  %s822_s0 = inlined_call_operand.vmem [shape: f32[9,16], index: 0, kind: input, shape index: {}]   ;;  %s823_s1 = inlined_call_operand.vmem [shape: f32[144,1], index: 1, kind: output, shape index: {}]  }
   0x1   :  { %v433_v0 = vld [vmem:[%s822_s0] sm:$0xff]   ;;  %v310_v1 = vld [vmem:[%s822_s0 + $0x8] sm:$0x1]   ;;  %s407_s24 = smov 125   ;;  %s408_s27 = smov 124  }
   0x2   :  { %33 = vrot.lane.b32.xlu1 %v433_v0, %s405_s8  ;;  %14 = vrot.lane.b32.xlu0 %v433_v0, %s406_s9  ;;  %4 = vst.msk [vmem:[%s823_s1] ss:$16 sm:$0x3] %vm3_vm0, %v433_v0   ;;  %5 = vst.msk [vmem:[%s823_s1] ss:$16 sm:$0xc] %vm3_vm0, %v433_v0  }
   0x3   :  { %6 = vst.msk [vmem:[%s823_s1] ss:$16 sm:$0x30] %vm3_vm0, %v433_v0   ;;  %7 = vst.msk [vmem:[%s823_s1] ss:$16 sm:$0xc0] %vm3_vm0, %v433_v0  }
   0x4   :  { %v304_v2 = vld [vmem:[%s822_s0 + $0x8] sm:$0x1]   ;;  %s409_s30 = smov 123   ;;  %s410_s4 = smov 122  }
   0x5   :  { %v316_v3 = vld [vmem:[%s822_s0 + $0x8] sm:$0x1]   ;;  %s411_s7 = smov 121   ;;  %s412_s10 = smov 120  }
   0x6   :  { %46 = vrot.lane.b32.xlu1 %v310_v1, %s405_s8  ;;  %27 = vrot.lane.b32.xlu0 %v304_v2, %s406_s9  ;;  %v322_v4 = vld [vmem:[%s822_s0 + $0x8] sm:$0x1]   ;;  %s413_s13 = smov 119   ;;  %s414_s16 = smov 118  }
   0x7   :  { %v328_v5 = vld [vmem:[%s822_s0 + $0x8] sm:$0x1]   ;;  %s415_s19 = smov 117   ;;  %s416_s26 = smov 116  }
   0x8   :  { %v334_v6 = vld [vmem:[%s822_s0 + $0x8] sm:$0x1]   ;;  %s417_s29 = smov 115   ;;  %s418_s3 = smov 114  }
   0x9   :  { %v340_v7 = vld [vmem:[%s822_s0 + $0x8] sm:$0x1]  }
   0xa   :  { %65 = vrot.lane.b32.xlu1 %v316_v3, %s407_s24  ;;  %52 = vrot.lane.b32.xlu0 %v433_v0, %s407_s24  ;;  %v346_v8 = vld [vmem:[%s822_s0 + $0x8] sm:$0x1]  }
   0xb   :  { %v352_v9 = vld [vmem:[%s822_s0 + $0x8] sm:$0x1]  }
   0xc   :  { %v358_v10 = vld [vmem:[%s822_s0 + $0x8] sm:$0x1]  }
   0xd   :  { %v364_v11 = vld [vmem:[%s822_s0 + $0x8] sm:$0x1]  }
   0xe   :  { %84 = vrot.lane.b32.xlu1 %v322_v4, %s408_s27  ;;  %71 = vrot.lane.b32.xlu0 %v433_v0, %s408_s27  ;;  %v370_v12 = vld [vmem:[%s822_s0 + $0x8] sm:$0x1]  }
   0xf   :  { %v298_v13 = vld [vmem:[%s822_s0 + $0x8] sm:$0x1]  }
  0x10   :  { %299 = vst.msk [vmem:[%s823_s1 + $0x80] sm:$0x1] %vm3_vm0, %v298_v13   ;;  %v376_v14 = vld [vmem:[%s822_s0 + $0x8] sm:$0x1]  }
  0x11   :  { %v382_v15 = vld [vmem:[%s822_s0 + $0x8] sm:$0x1]  }
  0x12   :  { %103 = vrot.lane.b32.xlu1 %v328_v5, %s409_s30  ;;  %90 = vrot.lane.b32.xlu0 %v433_v0, %s409_s30  ;;  %v388_v16 = vld [vmem:[%s822_s0 + $0x8] sm:$0x1]   ;;  %s419_s0 = smov 113  }
  0x16   :  { %122 = vrot.lane.b32.xlu1 %v334_v6, %s410_s4  ;;  %109 = vrot.lane.b32.xlu0 %v433_v0, %s410_s4 }
  0x1a   :  { %141 = vrot.lane.b32.xlu1 %v340_v7, %s411_s7  ;;  %128 = vrot.lane.b32.xlu0 %v433_v0, %s411_s7 }
  0x1e   :  { %160 = vrot.lane.b32.xlu1 %v346_v8, %s412_s10  ;;  %147 = vrot.lane.b32.xlu0 %v433_v0, %s412_s10 }
  0x22   :  { %179 = vrot.lane.b32.xlu1 %v352_v9, %s413_s13  ;;  %166 = vrot.lane.b32.xlu0 %v433_v0, %s413_s13 }
  0x26   :  { %198 = vrot.lane.b32.xlu1 %v358_v10, %s414_s16  ;;  %185 = vrot.lane.b32.xlu0 %v433_v0, %s414_s16 }
  0x2a   :  { %217 = vrot.lane.b32.xlu1 %v364_v11, %s415_s19  ;;  %204 = vrot.lane.b32.xlu0 %v433_v0, %s415_s19 }
  0x2e   :  { %236 = vrot.lane.b32.xlu1 %v370_v12, %s416_s26  ;;  %223 = vrot.lane.b32.xlu0 %v433_v0, %s416_s26 }
  0x32   :  { %255 = vrot.lane.b32.xlu1 %v376_v14, %s417_s29  ;;  %242 = vrot.lane.b32.xlu0 %v433_v0, %s417_s29 }
  0x36   :  { %274 = vrot.lane.b32.xlu1 %v382_v15, %s418_s3  ;;  %261 = vrot.lane.b32.xlu0 %v433_v0, %s418_s3 }
  0x3a   :  { %293 = vrot.lane.b32.xlu1 %v388_v16, %s419_s0  ;;  %280 = vrot.lane.b32.xlu0 %v433_v0, %s419_s0 }
  0x74   :  { %v34_v17 = vpop.permute.xlu1 %33   ;;  %v15_v18 = vpop.permute.xlu0 %14  }
  0x75   :  { %306 = vst.msk [vmem:[%s823_s1 + $0x2] ss:$16 sm:$0x3] %vm3_vm0, %v34_v17   ;;  %307 = vst.msk [vmem:[%s823_s1 + $0x2] ss:$16 sm:$0xc] %vm3_vm0, %v34_v17  }
  0x76   :  { %308 = vst.msk [vmem:[%s823_s1 + $0x2] ss:$16 sm:$0x30] %vm3_vm0, %v34_v17   ;;  %309 = vst.msk [vmem:[%s823_s1 + $0x2] ss:$16 sm:$0xc0] %vm3_vm0, %v34_v17  }
  0x77   :  { %300 = vst.msk [vmem:[%s823_s1 + $0x1] ss:$16 sm:$0x3] %vm3_vm0, %v15_v18   ;;  %301 = vst.msk [vmem:[%s823_s1 + $0x1] ss:$16 sm:$0xc] %vm3_vm0, %v15_v18  }
  0x78   :  { %302 = vst.msk [vmem:[%s823_s1 + $0x1] ss:$16 sm:$0x30] %vm3_vm0, %v15_v18   ;;  %303 = vst.msk [vmem:[%s823_s1 + $0x1] ss:$16 sm:$0xc0] %vm3_vm0, %v15_v18   ;;  %v47_v19 = vpop.permute.xlu1 %46   ;;  %v28_v20 = vpop.permute.xlu0 %27  }
  0x79   :  { %311 = vst.msk [vmem:[%s823_s1 + $0x82] sm:$0x1] %vm3_vm0, %v47_v19   ;;  %305 = vst.msk [vmem:[%s823_s1 + $0x81] sm:$0x1] %vm3_vm0, %v28_v20  }
  0x7c   :  { %v66_v21 = vpop.permute.xlu1 %65   ;;  %v53_v22 = vpop.permute.xlu0 %52  }
  0x7d   :  { %317 = vst.msk [vmem:[%s823_s1 + $0x83] sm:$0x1] %vm3_vm0, %v66_v21   ;;  %312 = vst.msk [vmem:[%s823_s1 + $0x3] ss:$16 sm:$0x3] %vm3_vm0, %v53_v22  }
  0x7e   :  { %313 = vst.msk [vmem:[%s823_s1 + $0x3] ss:$16 sm:$0xc] %vm3_vm0, %v53_v22   ;;  %314 = vst.msk [vmem:[%s823_s1 + $0x3] ss:$16 sm:$0x30] %vm3_vm0, %v53_v22  }
  0x7f   :  { %315 = vst.msk [vmem:[%s823_s1 + $0x3] ss:$16 sm:$0xc0] %vm3_vm0, %v53_v22  }
  0x80   :  { %v85_v23 = vpop.permute.xlu1 %84   ;;  %v72_v24 = vpop.permute.xlu0 %71  }
  0x81   :  { %323 = vst.msk [vmem:[%s823_s1 + $0x84] sm:$0x1] %vm3_vm0, %v85_v23   ;;  %318 = vst.msk [vmem:[%s823_s1 + $0x4] ss:$16 sm:$0x3] %vm3_vm0, %v72_v24  }
  0x82   :  { %319 = vst.msk [vmem:[%s823_s1 + $0x4] ss:$16 sm:$0xc] %vm3_vm0, %v72_v24   ;;  %320 = vst.msk [vmem:[%s823_s1 + $0x4] ss:$16 sm:$0x30] %vm3_vm0, %v72_v24  }
  0x83   :  { %321 = vst.msk [vmem:[%s823_s1 + $0x4] ss:$16 sm:$0xc0] %vm3_vm0, %v72_v24  }
  0x84   :  { %v104_v25 = vpop.permute.xlu1 %103   ;;  %v91_v26 = vpop.permute.xlu0 %90  }
  0x85   :  { %329 = vst.msk [vmem:[%s823_s1 + $0x85] sm:$0x1] %vm3_vm0, %v104_v25   ;;  %324 = vst.msk [vmem:[%s823_s1 + $0x5] ss:$16 sm:$0x3] %vm3_vm0, %v91_v26  }
  0x86   :  { %325 = vst.msk [vmem:[%s823_s1 + $0x5] ss:$16 sm:$0xc] %vm3_vm0, %v91_v26   ;;  %326 = vst.msk [vmem:[%s823_s1 + $0x5] ss:$16 sm:$0x30] %vm3_vm0, %v91_v26  }
  0x87   :  { %327 = vst.msk [vmem:[%s823_s1 + $0x5] ss:$16 sm:$0xc0] %vm3_vm0, %v91_v26  }
  0x88   :  { %v123_v27 = vpop.permute.xlu1 %122   ;;  %v110_v28 = vpop.permute.xlu0 %109  }
  0x89   :  { %335 = vst.msk [vmem:[%s823_s1 + $0x86] sm:$0x1] %vm3_vm0, %v123_v27   ;;  %330 = vst.msk [vmem:[%s823_s1 + $0x6] ss:$16 sm:$0x3] %vm3_vm0, %v110_v28  }
  0x8a   :  { %331 = vst.msk [vmem:[%s823_s1 + $0x6] ss:$16 sm:$0xc] %vm3_vm0, %v110_v28   ;;  %332 = vst.msk [vmem:[%s823_s1 + $0x6] ss:$16 sm:$0x30] %vm3_vm0, %v110_v28  }
  0x8b   :  { %333 = vst.msk [vmem:[%s823_s1 + $0x6] ss:$16 sm:$0xc0] %vm3_vm0, %v110_v28  }
  0x8c   :  { %v142_v29 = vpop.permute.xlu1 %141   ;;  %v129_v30 = vpop.permute.xlu0 %128  }
  0x8d   :  { %341 = vst.msk [vmem:[%s823_s1 + $0x87] sm:$0x1] %vm3_vm0, %v142_v29   ;;  %336 = vst.msk [vmem:[%s823_s1 + $0x7] ss:$16 sm:$0x3] %vm3_vm0, %v129_v30  }
  0x8e   :  { %337 = vst.msk [vmem:[%s823_s1 + $0x7] ss:$16 sm:$0xc] %vm3_vm0, %v129_v30   ;;  %338 = vst.msk [vmem:[%s823_s1 + $0x7] ss:$16 sm:$0x30] %vm3_vm0, %v129_v30  }
  0x8f   :  { %339 = vst.msk [vmem:[%s823_s1 + $0x7] ss:$16 sm:$0xc0] %vm3_vm0, %v129_v30  }
  0x90   :  { %v161_v31 = vpop.permute.xlu1 %160   ;;  %v148_v32 = vpop.permute.xlu0 %147  }
  0x91   :  { %347 = vst.msk [vmem:[%s823_s1 + $0x88] sm:$0x1] %vm3_vm0, %v161_v31   ;;  %342 = vst.msk [vmem:[%s823_s1 + $0x8] ss:$16 sm:$0x3] %vm3_vm0, %v148_v32  }
  0x92   :  { %343 = vst.msk [vmem:[%s823_s1 + $0x8] ss:$16 sm:$0xc] %vm3_vm0, %v148_v32   ;;  %344 = vst.msk [vmem:[%s823_s1 + $0x8] ss:$16 sm:$0x30] %vm3_vm0, %v148_v32  }
  0x93   :  { %345 = vst.msk [vmem:[%s823_s1 + $0x8] ss:$16 sm:$0xc0] %vm3_vm0, %v148_v32  }
  0x94   :  { %v180_v33 = vpop.permute.xlu1 %179   ;;  %v167_v34 = vpop.permute.xlu0 %166  }
  0x95   :  { %353 = vst.msk [vmem:[%s823_s1 + $0x89] sm:$0x1] %vm3_vm0, %v180_v33   ;;  %348 = vst.msk [vmem:[%s823_s1 + $0x9] ss:$16 sm:$0x3] %vm3_vm0, %v167_v34  }
  0x96   :  { %349 = vst.msk [vmem:[%s823_s1 + $0x9] ss:$16 sm:$0xc] %vm3_vm0, %v167_v34   ;;  %350 = vst.msk [vmem:[%s823_s1 + $0x9] ss:$16 sm:$0x30] %vm3_vm0, %v167_v34  }
  0x97   :  { %351 = vst.msk [vmem:[%s823_s1 + $0x9] ss:$16 sm:$0xc0] %vm3_vm0, %v167_v34  }
  0x98   :  { %v199_v35 = vpop.permute.xlu1 %198   ;;  %v186_v36 = vpop.permute.xlu0 %185  }
  0x99   :  { %359 = vst.msk [vmem:[%s823_s1 + $0x8a] sm:$0x1] %vm3_vm0, %v199_v35   ;;  %354 = vst.msk [vmem:[%s823_s1 + $0xa] ss:$16 sm:$0x3] %vm3_vm0, %v186_v36  }
  0x9a   :  { %355 = vst.msk [vmem:[%s823_s1 + $0xa] ss:$16 sm:$0xc] %vm3_vm0, %v186_v36   ;;  %356 = vst.msk [vmem:[%s823_s1 + $0xa] ss:$16 sm:$0x30] %vm3_vm0, %v186_v36  }
  0x9b   :  { %357 = vst.msk [vmem:[%s823_s1 + $0xa] ss:$16 sm:$0xc0] %vm3_vm0, %v186_v36  }
  0x9c   :  { %v218_v37 = vpop.permute.xlu1 %217   ;;  %v205_v38 = vpop.permute.xlu0 %204  }
  0x9d   :  { %365 = vst.msk [vmem:[%s823_s1 + $0x8b] sm:$0x1] %vm3_vm0, %v218_v37   ;;  %360 = vst.msk [vmem:[%s823_s1 + $0xb] ss:$16 sm:$0x3] %vm3_vm0, %v205_v38  }
  0x9e   :  { %361 = vst.msk [vmem:[%s823_s1 + $0xb] ss:$16 sm:$0xc] %vm3_vm0, %v205_v38   ;;  %362 = vst.msk [vmem:[%s823_s1 + $0xb] ss:$16 sm:$0x30] %vm3_vm0, %v205_v38  }
  0x9f   :  { %363 = vst.msk [vmem:[%s823_s1 + $0xb] ss:$16 sm:$0xc0] %vm3_vm0, %v205_v38  }
  0xa0   :  { %v237_v39 = vpop.permute.xlu1 %236   ;;  %v224_v40 = vpop.permute.xlu0 %223  }
  0xa1   :  { %371 = vst.msk [vmem:[%s823_s1 + $0x8c] sm:$0x1] %vm3_vm0, %v237_v39   ;;  %366 = vst.msk [vmem:[%s823_s1 + $0xc] ss:$16 sm:$0x3] %vm3_vm0, %v224_v40  }
  0xa2   :  { %367 = vst.msk [vmem:[%s823_s1 + $0xc] ss:$16 sm:$0xc] %vm3_vm0, %v224_v40   ;;  %368 = vst.msk [vmem:[%s823_s1 + $0xc] ss:$16 sm:$0x30] %vm3_vm0, %v224_v40  }
  0xa3   :  { %369 = vst.msk [vmem:[%s823_s1 + $0xc] ss:$16 sm:$0xc0] %vm3_vm0, %v224_v40  }
  0xa4   :  { %v256_v41 = vpop.permute.xlu1 %255   ;;  %v243_v42 = vpop.permute.xlu0 %242  }
  0xa5   :  { %377 = vst.msk [vmem:[%s823_s1 + $0x8d] sm:$0x1] %vm3_vm0, %v256_v41   ;;  %372 = vst.msk [vmem:[%s823_s1 + $0xd] ss:$16 sm:$0x3] %vm3_vm0, %v243_v42  }
  0xa6   :  { %373 = vst.msk [vmem:[%s823_s1 + $0xd] ss:$16 sm:$0xc] %vm3_vm0, %v243_v42   ;;  %374 = vst.msk [vmem:[%s823_s1 + $0xd] ss:$16 sm:$0x30] %vm3_vm0, %v243_v42  }
  0xa7   :  { %375 = vst.msk [vmem:[%s823_s1 + $0xd] ss:$16 sm:$0xc0] %vm3_vm0, %v243_v42  }
  0xa8   :  { %v275_v43 = vpop.permute.xlu1 %274   ;;  %v262_v44 = vpop.permute.xlu0 %261  }
  0xa9   :  { %383 = vst.msk [vmem:[%s823_s1 + $0x8e] sm:$0x1] %vm3_vm0, %v275_v43   ;;  %378 = vst.msk [vmem:[%s823_s1 + $0xe] ss:$16 sm:$0x3] %vm3_vm0, %v262_v44  }
  0xaa   :  { %379 = vst.msk [vmem:[%s823_s1 + $0xe] ss:$16 sm:$0xc] %vm3_vm0, %v262_v44   ;;  %380 = vst.msk [vmem:[%s823_s1 + $0xe] ss:$16 sm:$0x30] %vm3_vm0, %v262_v44  }
  0xab   :  { %381 = vst.msk [vmem:[%s823_s1 + $0xe] ss:$16 sm:$0xc0] %vm3_vm0, %v262_v44  }
  0xac   :  { %v294_v45 = vpop.permute.xlu1 %293   ;;  %v281_v46 = vpop.permute.xlu0 %280  }
  0xad   :  { %389 = vst.msk [vmem:[%s823_s1 + $0x8f] sm:$0x1] %vm3_vm0, %v294_v45   ;;  %384 = vst.msk [vmem:[%s823_s1 + $0xf] ss:$16 sm:$0x3] %vm3_vm0, %v281_v46  }
  0xae   :  { %385 = vst.msk [vmem:[%s823_s1 + $0xf] ss:$16 sm:$0xc] %vm3_vm0, %v281_v46   ;;  %386 = vst.msk [vmem:[%s823_s1 + $0xf] ss:$16 sm:$0x30] %vm3_vm0, %v281_v46  }
  0xaf   :  { %387 = vst.msk [vmem:[%s823_s1 + $0xf] ss:$16 sm:$0xc0] %vm3_vm0, %v281_v46  }

// kernel: neg.1
= control target key start
LH: loop header
LB: loop body
LE: loop exit
PB: predicated region body
PF: predicated region fallthrough
CT: control target
= control target key end

     0   :  { %s40_s0 = inlined_call_operand.vmem [shape: f32[32,9], index: 0, kind: input, shape index: {}]   ;;  %s41_s1 = inlined_call_operand.vmem [shape: f32[32,9], index: 1, kind: output, shape index: {}]  }
   0x1   :  { %v2_v0 = vld [vmem:[%s40_s0] sm:$0xff]  ;;  %v16_v1 = vld [vmem:[%s40_s0 + $0x8] sm:$0xff] }
   0x2   :  { %v5_v2 = vxor.u32 2147483648, %v2_v0  ;;  %v12_v3 = vxor.u32 2147483648, %v16_v1 }
   0x4   :  { %7 = vst [vmem:[%s41_s1] sm:$0xff] %v5_v2  ;;  %17 = vst [vmem:[%s41_s1 + $0x8] sm:$0xff] %v12_v3 }

// kernel: unit2_forward.1
= control target key start
LH: loop header
LB: loop body
LE: loop exit
PB: predicated region body
PF: predicated region fallthrough
CT: control target
= control target key end

     0   :  { %vm171_vm0 = vcmask 662528   ;;  %v929_v2 = vmov 0   ;;  %vm226_vm1 = vcmask 1040384   ;;  %v930_v48 = vmov 0.0|0.0   ;;  %s1203_s0 = inlined_call_operand.vmem [shape: bf16[81,128], index: 0, kind: input, shape index: {}]   ;;  %s1204_s1 = inlined_call_operand.vmem [shape: f32[144,81], index: 1, kind: input, shape index: {}]   ;;  %s1205_s2 = inlined_call_operand.vmem [shape: f32[144,1], index: 2, kind: input, shape index: {}]   ;;  %s1206_s5 = inlined_call_operand.vmem [shape: f32[32,1], index: 5, kind: input, shape index: {}]   ;;  %s1207_s4 = inlined_call_operand.vmem [shape: f32[32,81], index: 4, kind: input, shape index: {}]   ;;  %s1208_s3 = inlined_call_operand.vmem [shape: f32[32,144], index: 3, kind: input, shape index: {}]   ;;  %s1209_s6 = inlined_call_operand.vmem [shape: bf16[32,128], index: 6, kind: output, shape index: {}]  }
   0x1   :  { %v703_v0 = vld [vmem:[%s1203_s0] sm:$0xff]   ;;  %v732_v1 = vld [vmem:[%s1203_s0 + $0x8] sm:$0xff]   ;;  %927 = vset.pattern.permute.xlu0 %v929_v2  ;;  %928 = vset.pattern.permute.xlu1 %v929_v2  ;;  %v733_v4 = vld [vmem:[%s1203_s0 + $0x10] sm:$0xff]   ;;  %vm512_vm2 = vcmask 130048  }
   0x2   :  { %859 = vmatprep.subr.bf16.mxu1 %v703_v0  ;;  %v45_v3 = vld [vmem:[%s1204_s1] sm:$0xff]  ;;  %v982_v5 = vld [vmem:[%s1203_s0 + $0x18] sm:$0xff]   ;;  %v65_v7 = vld [vmem:[%s1205_s2 + $0x10] sm:$0xff]  ;;  %898 = vmatprep.subr.bf16.mxu0 %v930_v48 }
   0x3   :  { %861 = vmatpush3.bf16.msra.mxu1 %v703_v0  ;;  %803 = vmatprep.mubr.msk.f32.mxu1 %vm171_vm0, %v45_v3  ;;  %v63_v6 = vld [vmem:[%s1205_s2] sm:$0xff]  ;;  %v64_v8 = vld [vmem:[%s1205_s2 + $0x8] sm:$0xff]  ;;  %v66_v9 = vld [vmem:[%s1205_s2 + $0x18] sm:$0xff] }
   0x4   :  { %863 = vmatprep.subr.bf16.mxu1 %v732_v1  ;;  %83 = vperm.xlu0 %927, %v63_v6   ;;  %v1000_v10 = vld [vmem:[%s1203_s0 + $0x20] sm:$0xff]   ;;  %v33_v11 = vld [vmem:[%s1203_s0 + $0x28] sm:$0x1]  ;;  %v69_v15 = vld [vmem:[%s1205_s2 + $0x30] sm:$0xff] }
   0x5   :  { %93 = vperm.xlu1 %928, %v65_v7   ;;  %v67_v12 = vld [vmem:[%s1205_s2 + $0x20] sm:$0xff]  ;;  %v68_v13 = vld [vmem:[%s1205_s2 + $0x28] sm:$0xff]  ;;  %v1013_v14 = vunpack.c.l.bf16 %v33_v11  ;;  %v70_v16 = vld [vmem:[%s1205_s2 + $0x38] sm:$0xff] }
   0x6   :  { %v46_v17 = vld [vmem:[%s1204_s1 + $0x8] sm:$0xff]  ;;  %v47_v18 = vld [vmem:[%s1204_s1 + $0x10] sm:$0xff]  ;;  %v71_v19 = vld [vmem:[%s1205_s2 + $0x40] sm:$0xff] }
   0x7   :  { %865 = vmatpush3.bf16.msra.mxu1 %v732_v1  ;;  %v72_v20 = vld [vmem:[%s1205_s2 + $0x48] sm:$0xff]  ;;  %v48_v21 = vld [vmem:[%s1204_s1 + $0x18] sm:$0xff]  ;;  %v49_v22 = vld [vmem:[%s1204_s1 + $0x20] sm:$0xff] }
   0x8   :  { %867 = vmatprep.subr.bf16.mxu1 %v733_v4  ;;  %88 = vperm.xlu0 %927, %v64_v8   ;;  %v73_v23 = vld [vmem:[%s1205_s2 + $0x50] sm:$0xff]  ;;  %v74_v24 = vld [vmem:[%s1205_s2 + $0x58] sm:$0xff]  ;;  %v50_v25 = vld [vmem:[%s1204_s1 + $0x28] sm:$0xff] }
   0x9   :  { %98 = vperm.xlu1 %928, %v66_v9   ;;  %v51_v26 = vld [vmem:[%s1204_s1 + $0x30] sm:$0xff]  ;;  %v75_v27 = vld [vmem:[%s1205_s2 + $0x60] sm:$0xff]  ;;  %v76_v28 = vld [vmem:[%s1205_s2 + $0x68] sm:$0xff] }
   0xa   :  { %v52_v29 = vld [vmem:[%s1204_s1 + $0x38] sm:$0xff]  ;;  %v53_v30 = vld [vmem:[%s1204_s1 + $0x40] sm:$0xff]  ;;  %v77_v31 = vld [vmem:[%s1205_s2 + $0x70] sm:$0xff] }
   0xb   :  { %869 = vmatpush3.bf16.msra.mxu1 %v733_v4  ;;  %v78_v32 = vld [vmem:[%s1205_s2 + $0x78] sm:$0xff]  ;;  %v54_v33 = vld [vmem:[%s1204_s1 + $0x48] sm:$0xff]  ;;  %v55_v34 = vld [vmem:[%s1204_s1 + $0x50] sm:$0xff] }
   0xc   :  { %871 = vmatprep.subr.bf16.mxu1 %v982_v5  ;;  %103 = vperm.xlu0 %927, %v67_v12   ;;  %v79_v35 = vld [vmem:[%s1205_s2 + $0x80] sm:$0xff]  ;;  %v80_v36 = vld [vmem:[%s1205_s2 + $0x88] sm:$0xff]  ;;  %v56_v37 = vld [vmem:[%s1204_s1 + $0x58] sm:$0xff] }
   0xd   :  { %108 = vperm.xlu1 %928, %v68_v13   ;;  %v57_v38 = vld [vmem:[%s1204_s1 + $0x60] sm:$0xff]  ;;  %v611_v40 = vld [vmem:[%s1206_s5 + $0x8] sm:$0xff]  ;;  %v59_v42 = vld [vmem:[%s1204_s1 + $0x70] sm:$0xff] }
   0xe   :  { %v610_v39 = vld [vmem:[%s1206_s5] sm:$0xff]  ;;  %v58_v41 = vld [vmem:[%s1204_s1 + $0x68] sm:$0xff]  ;;  %v612_v43 = vld [vmem:[%s1206_s5 + $0x10] sm:$0xff] }
   0xf   :  { %873 = vmatpush3.bf16.msra.mxu1 %v982_v5  ;;  %v613_v44 = vld [vmem:[%s1206_s5 + $0x18] sm:$0xff]  ;;  %v61_v46 = vld [vmem:[%s1204_s1 + $0x80] sm:$0xff]  ;;  %v62_v47 = vld [vmem:[%s1204_s1 + $0x88] sm:$0xff] }
  0x10   :  { %875 = vmatprep.subr.bf16.mxu1 %v1000_v10  ;;  %113 = vperm.xlu0 %927, %v69_v15   ;;  %v60_v45 = vld [vmem:[%s1204_s1 + $0x78] sm:$0xff]  ;;  %v411_v49 = vld [vmem:[%s1207_s4] sm:$0xff]  ;;  %v412_v50 = vld [vmem:[%s1207_s4 + $0x8] sm:$0xff] }
  0x11   :  { %118 = vperm.xlu1 %928, %v70_v16   ;;  %v404_v51 = vld [vmem:[%s1208_s3 + $0x8] sm:$0xff]  ;;  %v413_v52 = vld [vmem:[%s1207_s4 + $0x10] sm:$0xff]  ;;  %v414_v53 = vld [vmem:[%s1207_s4 + $0x18] sm:$0xff] }
  0x12   :  { %690 = vmatprep.mubr.msk.f32.mxu0 %vm512_vm2, %v404_v51 }
  0x13   :  { %877 = vmatpush3.bf16.msra.mxu1 %v1000_v10 }
  0x14   :  { %801 = vmatprep.subr.msk.mxu1 %vm226_vm1, %v1013_v14  ;;  %123 = vperm.xlu0 %927, %v71_v19  }
  0x15   :  { %128 = vperm.xlu1 %928, %v72_v20  }
  0x17   :  { %802 = vmatpush3.msk.msra.mxu1 %vm226_vm1, %v1013_v14 }
  0x18   :  { %804 = vmatmul.mubr.msk.f32.vlgmr.msra.gmra.mrb[0].mxu1 %vm171_vm0, %v46_v17  ;;  %879 = vmatprep.subr.bf16.mxu1 %v703_v0 }
  0x19   :  { %806 = vmatprep.mubr.msk.f32.mxu1 %vm171_vm0, %v47_v18  ;;  %881 = vmatpush3.bf16.msra.mxu1 %v703_v0 }
  0x1a   :  { %883 = vmatprep.subr.bf16.mxu1 %v732_v1  ;;  %133 = vperm.xlu0 %927, %v73_v23  }
  0x1b   :  { %138 = vperm.xlu1 %928, %v74_v24  }
  0x1c   :  { %807 = vmatmul.mubr.msk.f32.gmra.mrb[2].mxu1 %vm171_vm0, %v48_v21 }
  0x1d   :  { %809 = vmatprep.mubr.msk.f32.mxu1 %vm171_vm0, %v49_v22  ;;  %885 = vmatpush3.bf16.msra.mxu1 %v732_v1 }
  0x1e   :  { %887 = vmatprep.subr.bf16.mxu1 %v733_v4  ;;  %143 = vperm.xlu0 %927, %v75_v27  }
  0x1f   :  { %148 = vperm.xlu1 %928, %v76_v28  }
  0x20   :  { %810 = vmatmul.mubr.msk.f32.gmra.mrb[4].mxu1 %vm171_vm0, %v50_v25 }
  0x21   :  { %812 = vmatprep.mubr.msk.f32.mxu1 %vm171_vm0, %v51_v26  ;;  %889 = vmatpush3.bf16.msra.mxu1 %v733_v4 }
  0x22   :  { %891 = vmatprep.subr.bf16.mxu1 %v982_v5  ;;  %153 = vperm.xlu0 %927, %v77_v31  }
  0x23   :  { %158 = vperm.xlu1 %928, %v78_v32  }
  0x24   :  { %813 = vmatmul.mubr.msk.f32.gmra.mrb[6].mxu1 %vm171_vm0, %v52_v29 }
  0x25   :  { %815 = vmatprep.mubr.msk.f32.mxu1 %vm171_vm0, %v53_v30  ;;  %893 = vmatpush3.bf16.msra.mxu1 %v982_v5 }
  0x26   :  { %895 = vmatprep.subr.bf16.mxu1 %v1000_v10  ;;  %163 = vperm.xlu0 %927, %v79_v35  }
  0x27   :  { %168 = vperm.xlu1 %928, %v80_v36  }
  0x28   :  { %816 = vmatmul.mubr.msk.f32.gmra.mrb[8].mxu1 %vm171_vm0, %v54_v33 }
  0x29   :  { %818 = vmatprep.mubr.msk.f32.mxu1 %vm171_vm0, %v55_v34  ;;  %897 = vmatpush3.bf16.msra.mxu1 %v1000_v10 }
  0x2a   :  { %850 = vmatprep.subr.msk.mxu1 %vm226_vm1, %v1013_v14  ;;  %616 = vperm.xlu0 %927, %v610_v39  }
  0x2b   :  { %621 = vperm.xlu1 %928, %v611_v40  }
  0x2c   :  { %819 = vmatmul.mubr.msk.f32.gmra.mrb[10].mxu1 %vm171_vm0, %v56_v37 }
  0x2d   :  { %821 = vmatprep.mubr.msk.f32.mxu1 %vm171_vm0, %v57_v38  ;;  %851 = vmatpush3.msk.msra.mxu1 %vm226_vm1, %v1013_v14 }
  0x2e   :  { %626 = vperm.xlu0 %927, %v612_v43  }
  0x2f   :  { %631 = vperm.xlu1 %928, %v613_v44  }
  0x30   :  { %822 = vmatmul.mubr.msk.f32.gmra.mrb[12].mxu1 %vm171_vm0, %v58_v41 }
  0x31   :  { %824 = vmatprep.mubr.msk.f32.mxu1 %vm171_vm0, %v59_v42 }
  0x34   :  { %825 = vmatmul.mubr.msk.f32.gmra.mrb[14].mxu1 %vm171_vm0, %v60_v45 }
  0x35   :  { %827 = vmatprep.mubr.msk.f32.mxu1 %vm171_vm0, %v61_v46 }
  0x38   :  { %828 = vmatmul.mubr.msk.f32.gmra.mrb[16].mxu1 %vm171_vm0, %v62_v47 }
  0x39   :  { %852 = vmatprep.mubr.msk.f32.mxu1 %vm171_vm0, %v411_v49 }
  0x3c   :  { %853 = vmatmul.mubr.msk.f32.vlgmr.msra.gmra.mrb[18].mxu1 %vm171_vm0, %v412_v50 }
  0x3d   :  { %855 = vmatprep.mubr.msk.f32.mxu1 %vm171_vm0, %v413_v52 }
  0x40   :  { %856 = vmatmul.mubr.msk.f32.gmra.mrb[20].mxu1 %vm171_vm0, %v414_v53 }
  0x83   :  { %v84_v55 = vpop.permute.xlu0 %83 }
  0x84   :  { %v94_v54 = vpop.permute.xlu1 %93 }
  0x87   :  { %v89_v57 = vpop.permute.xlu0 %88 }
  0x88   :  { %v99_v56 = vpop.permute.xlu1 %98 }
  0x8b   :  { %v104_v59 = vpop.permute.xlu0 %103 }
  0x8c   :  { %v109_v58 = vpop.permute.xlu1 %108 }
  0x8f   :  { %v114_v1 = vpop.permute.xlu0 %113 }
  0x90   :  { %v119_v63 = vpop.permute.xlu1 %118 }
  0x93   :  { %v124_v13 = vpop.permute.xlu0 %123 }
  0x94   :  { %v129_v10 = vpop.permute.xlu1 %128 }
  0x99   :  { %v134_v26 = vpop.permute.xlu0 %133 }
  0x9a   :  { %v139_v23 = vpop.permute.xlu1 %138 }
  0x9d   :  { %v144_v38 = vpop.permute.xlu0 %143 }
  0x9e   :  { %v149_v35 = vpop.permute.xlu1 %148 }
  0xa1   :  { %v154_v52 = vpop.permute.xlu0 %153 }
  0xa2   :  { %v159_v49 = vpop.permute.xlu1 %158 }
  0xeb   :  { %v805_v60 = vpop.f32.mrb[0].mxu1 }
  0xec   :  { %v302_v61 = vadd.f32 %v805_v60, %v89_v57  ;;  %v296_v62 = vpop.f32.mrb[1].mxu1 }
  0xed   :  { %v297_v0 = vadd.f32 %v296_v62, %v84_v55 }
  0xee   :  { %v386_v2 = vmax.f32 %v302_v61, 0.0  ;;  %v169_v61 = vpop.permute.xlu1 %168 }
  0xef   :  { %v385_v3 = vmax.f32 %v297_v0, 0.0  ;;  %v808_v4 = vpop.f32.mrb[2].mxu1  ;;  %v164_v0 = vpop.permute.xlu0 %163 }
  0xf0   :  { %v312_v5 = vadd.f32 %v808_v4, %v99_v56  ;;  %v306_v6 = vpop.f32.mrb[3].mxu1 }
  0xf1   :  { %v307_v7 = vadd.f32 %v306_v6, %v94_v54  ;;  %v899_v8 = vpack.c.bf16 %v386_v2, %v385_v3 }
  0xf2   :  { %v388_v9 = vmax.f32 %v312_v5, 0.0 }
  0xf3   :  { %v387_v11 = vmax.f32 %v307_v7, 0.0  ;;  %v811_v12 = vpop.f32.mrb[4].mxu1  ;;  %900 = vmatpush1.bf16.msra.mxu0 %v899_v8  ;;  %v403_v8 = vld [vmem:[%s1208_s3] sm:$0xff] }
  0xf4   :  { %v322_v14 = vadd.f32 %v811_v12, %v109_v58  ;;  %v316_v15 = vpop.f32.mrb[5].mxu1  ;;  %901 = vmatprep.subr.bf16.mxu0 %v930_v48  ;;  %v410_v12 = vld [vmem:[%s1208_s3 + $0x38] sm:$0xff] }
  0xf5   :  { %v902_v16 = vpack.c.bf16 %v388_v9, %v387_v11  ;;  %v317_v17 = vadd.f32 %v316_v15, %v104_v59  ;;  %v406_v9 = vld [vmem:[%s1208_s3 + $0x18] sm:$0xff]  ;;  %v407_v11 = vld [vmem:[%s1208_s3 + $0x20] sm:$0xff] }
  0xf6   :  { %v390_v18 = vmax.f32 %v322_v14, 0.0 }
  0xf7   :  { %v389_v19 = vmax.f32 %v317_v17, 0.0  ;;  %v814_v20 = vpop.f32.mrb[6].mxu1  ;;  %903 = vmatpush1.bf16.msra.mxu0 %v902_v16 }
  0xf8   :  { %v332_v21 = vadd.f32 %v814_v20, %v119_v63  ;;  %v326_v22 = vpop.f32.mrb[7].mxu1  ;;  %904 = vmatprep.subr.bf16.mxu0 %v930_v48 }
  0xf9   :  { %v905_v24 = vpack.c.bf16 %v390_v18, %v389_v19  ;;  %v327_v25 = vadd.f32 %v326_v22, %v114_v1 }
  0xfa   :  { %v392_v27 = vmax.f32 %v332_v21, 0.0  ;;  %v617_v21 = vpop.permute.xlu0 %616 }
  0xfb   :  { %v391_v28 = vmax.f32 %v327_v25, 0.0  ;;  %v817_v29 = vpop.f32.mrb[8].mxu1  ;;  %906 = vmatpush1.bf16.msra.mxu0 %v905_v24 }
  0xfc   :  { %v342_v30 = vadd.f32 %v817_v29, %v129_v10  ;;  %v336_v31 = vpop.f32.mrb[9].mxu1  ;;  %907 = vmatprep.subr.bf16.mxu0 %v930_v48  ;;  %v405_v10 = vld [vmem:[%s1208_s3 + $0x10] sm:$0xff] }
  0xfd   :  { %v908_v32 = vpack.c.bf16 %v392_v27, %v391_v28  ;;  %v337_v33 = vadd.f32 %v336_v31, %v124_v13  ;;  %v409_v13 = vld [vmem:[%s1208_s3 + $0x30] sm:$0xff] }
  0xfe   :  { %v394_v34 = vmax.f32 %v342_v30, 0.0 }
  0xff   :  { %v393_v36 = vmax.f32 %v337_v33, 0.0  ;;  %v820_v37 = vpop.f32.mrb[10].mxu1  ;;  %909 = vmatpush1.bf16.msra.mxu0 %v908_v32 }
 0x100   :  { %v352_v39 = vadd.f32 %v820_v37, %v139_v23  ;;  %v346_v40 = vpop.f32.mrb[11].mxu1  ;;  %910 = vmatprep.subr.bf16.mxu0 %v930_v48 }
 0x101   :  { %v911_v41 = vpack.c.bf16 %v394_v34, %v393_v36  ;;  %v347_v42 = vadd.f32 %v346_v40, %v134_v26  ;;  %v622_v26 = vpop.permute.xlu1 %621  ;;  %v627_v34 = vpop.permute.xlu0 %626 }
 0x102   :  { %v396_v43 = vmax.f32 %v352_v39, 0.0 }
 0x103   :  { %v395_v44 = vmax.f32 %v347_v42, 0.0  ;;  %v823_v45 = vpop.f32.mrb[12].mxu1  ;;  %912 = vmatpush1.bf16.msra.mxu0 %v911_v41 }
 0x104   :  { %v362_v46 = vadd.f32 %v823_v45, %v149_v35  ;;  %v356_v47 = vpop.f32.mrb[13].mxu1  ;;  %913 = vmatprep.subr.bf16.mxu0 %v930_v48 }
 0x105   :  { %v914_v50 = vpack.c.bf16 %v396_v43, %v395_v44  ;;  %v357_v51 = vadd.f32 %v356_v47, %v144_v38  ;;  %v632_v39 = vpop.permute.xlu1 %631 }
 0x106   :  { %v398_v53 = vmax.f32 %v362_v46, 0.0 }
 0x107   :  { %v397_v54 = vmax.f32 %v357_v51, 0.0  ;;  %v826_v55 = vpop.f32.mrb[14].mxu1  ;;  %915 = vmatpush1.bf16.msra.mxu0 %v914_v50 }
 0x108   :  { %v372_v56 = vadd.f32 %v826_v55, %v159_v49  ;;  %v366_v57 = vpop.f32.mrb[15].mxu1  ;;  %916 = vmatprep.subr.bf16.mxu0 %v930_v48 }
 0x109   :  { %v917_v58 = vpack.c.bf16 %v398_v53, %v397_v54  ;;  %v367_v59 = vadd.f32 %v366_v57, %v154_v52 }
 0x10a   :  { %v400_v60 = vmax.f32 %v372_v56, 0.0 }
 0x10b   :  { %v399_v62 = vmax.f32 %v367_v59, 0.0  ;;  %v829_v63 = vpop.f32.mrb[16].mxu1  ;;  %918 = vmatpush1.bf16.msra.mxu0 %v917_v58 }
 0x10c   :  { %v382_v1 = vadd.f32 %v829_v63, %v169_v61  ;;  %v376_v2 = vpop.f32.mrb[17].mxu1  ;;  %919 = vmatprep.subr.bf16.mxu0 %v930_v48 }
 0x10d   :  { %v920_v3 = vpack.c.bf16 %v400_v60, %v399_v62  ;;  %v377_v4 = vadd.f32 %v376_v2, %v164_v0 }
 0x10e   :  { %v402_v5 = vmax.f32 %v382_v1, 0.0 }
 0x10f   :  { %v401_v6 = vmax.f32 %v377_v4, 0.0  ;;  %921 = vmatpush1.bf16.msra.mxu0 %v920_v3  ;;  %v854_v14 = vpop.f32.mrb[18].mxu1 }
 0x110   :  { %922 = vmatprep.subr.bf16.mxu0 %v930_v48  ;;  %v408_v48 = vld [vmem:[%s1208_s3 + $0x28] sm:$0xff]  ;;  %v493_v15 = vpop.f32.mrb[19].mxu1 }
 0x111   :  { %v923_v7 = vpack.c.bf16 %v402_v5, %v401_v6 }
 0x113   :  { %924 = vmatpush1.bf16.msra.mxu0 %v923_v7  ;;  %v857_v16 = vpop.f32.mrb[20].mxu1 }
 0x114   :  { %v503_v17 = vpop.f32.mrb[21].mxu1 }
 0x116   :  { %590 = vmatmul.mubr.f32.vlgmr.msra.gmra.mrb[0].mxu0 %v403_v8 }
 0x117   :  { %691 = vmatprep.mubr.msk.f32.mxu0 %vm512_vm2, %v406_v9 }
 0x11a   :  { %595 = vmatmul.mubr.f32.gmra.mrb[2].mxu0 %v405_v10 }
 0x11b   :  { %692 = vmatprep.mubr.msk.f32.mxu0 %vm512_vm2, %v408_v48 }
 0x11e   :  { %600 = vmatmul.mubr.f32.gmra.mrb[4].mxu0 %v407_v11 }
 0x11f   :  { %693 = vmatprep.mubr.msk.f32.mxu0 %vm512_vm2, %v410_v12 }
 0x122   :  { %605 = vmatmul.mubr.f32.gmra.mrb[6].mxu0 %v409_v13 }
 0x1e9   :  { %v591_v18 = vpop.f32.mrb[0].mxu0 }
 0x1ea   :  { %v592_v19 = vadd.f32 %v591_v18, %v493_v15  ;;  %v593_v20 = vpop.f32.mrb[1].mxu0 }
 0x1ec   :  { %v634_v23 = vadd.f32 %v617_v21, %v592_v19 }
 0x1ed   :  { %v596_v22 = vpop.f32.mrb[2].mxu0 }
 0x1ee   :  { %v597_v24 = vadd.f32 %v854_v14, %v596_v22  ;;  %v598_v25 = vpop.f32.mrb[3].mxu0  ;;  %v638_v29 = vmax.f32 %v634_v23, 0.0 }
 0x1f0   :  { %v635_v27 = vadd.f32 %v622_v26, %v597_v24 }
 0x1f1   :  { %v601_v28 = vpop.f32.mrb[4].mxu0 }
 0x1f2   :  { %v639_v30 = vmax.f32 %v635_v27, 0.0  ;;  %v602_v31 = vadd.f32 %v601_v28, %v503_v17  ;;  %v603_v32 = vpop.f32.mrb[5].mxu0 }
 0x1f4   :  { %v725_v33 = vpack.c.bf16 %v639_v30, %v638_v29  ;;  %v636_v36 = vadd.f32 %v627_v34, %v602_v31 }
 0x1f5   :  { %v606_v35 = vpop.f32.mrb[6].mxu0 }
 0x1f6   :  { %726 = vst [vmem:[%s1209_s6] sm:$0xff] %v725_v33   ;;  %v607_v37 = vadd.f32 %v857_v16, %v606_v35  ;;  %v608_v38 = vpop.f32.mrb[7].mxu0  ;;  %v640_v41 = vmax.f32 %v636_v36, 0.0 }
 0x1f8   :  { %v637_v40 = vadd.f32 %v632_v39, %v607_v37 }
 0x1fa   :  { %v641_v42 = vmax.f32 %v637_v40, 0.0 }
 0x1fc   :  { %v730_v43 = vpack.c.bf16 %v641_v42, %v640_v41 }
 0x1fe   :  { %736 = vst [vmem:[%s1209_s6 + $0x8] sm:$0xff] %v730_v43  }

</bundles_post_ra>
